<compile_context>
chip_gen: v6e
topology: v6e:2x2x1
jax: 0.10.0
libtpu: 0.0.40
codegen_flags: <defaults>
</compile_context>

<pallas_src>
import functools

import jax
import jax.numpy as jnp
from jax.experimental import pallas as pl
from jax.experimental.pallas import tpu as pltpu


def _round_up(x, m):
  return (x + m - 1) // m * m


def _pad_to(x, shape):
  return jnp.pad(x, [(0, t - s) for s, t in zip(x.shape, shape)])


def stacked_lstm_kernel(x_ref, w0_ref, h0_ref, c0_ref, w_in_ref, w_hh_ref,
                        b_ref, h1_ref, c1_ref, hprev_ref):
  """One grid step == one LSTM layer.  Inter-layer carry stays in VMEM."""
  layer = pl.program_id(0)
  num_layers = pl.num_programs(0)
  H = h0_ref.shape[-1]          # true hidden size (each gate is exactly H wide)
  g4 = b_ref.shape[-1]          # round_up(4*H, 128) packed gate columns
  f32 = jnp.float32

  # Layer 0 has no previous-layer hidden state; zero the carry so the (zero)
  # streamed W_in[0] contribution is exactly zero (no 0 * garbage risk).
  @pl.when(layer == 0)
  def _():
    hprev_ref[...] = jnp.zeros_like(hprev_ref)

  # Layer-0 input projection on the resident (x, W_ih[0]) pair.  Operands are
  # already in VMEM and M is tiny, so it is computed every step and masked
  # with a 0/1 scalar instead of branching an MXU op.
  first = (layer == 0).astype(f32)
  gx = first * jnp.dot(x_ref[...].astype(f32), w0_ref[...].astype(f32),
                       preferred_element_type=f32)

  # gates = x / h_prev projection + own-h0 projection + bias (f32 accumulate;
  # weights arrive as bf16 and are upcast in-register).
  gates = (gx
           + jnp.dot(hprev_ref[...], w_in_ref[0].astype(f32),
                     preferred_element_type=f32)
           + jnp.dot(h0_ref[0].astype(f32), w_hh_ref[0].astype(f32),
                     preferred_element_type=f32)
           + b_ref[0])

  # Packed-gate extraction.  If H is lane-aligned the slice is a free vreg
  # slice; otherwise extract with an exact one-hot selection matmul on the
  # (idle, DMA-bound) MXU so every vector op stays at lane offset 0.
  if H % 128 == 0:
    def gate(idx):
      return gates[:, idx * H:(idx + 1) * H]
  else:
    rows = jax.lax.broadcasted_iota(jnp.int32, (g4, H), 0)
    cols = jax.lax.broadcasted_iota(jnp.int32, (g4, H), 1)

    def gate(idx):
      sel = (rows == cols + idx * H).astype(f32)       # (g4, H) one-hot
      return jnp.dot(gates, sel, preferred_element_type=f32)

  i_g = jax.nn.sigmoid(gate(0))
  f_g = jax.nn.sigmoid(gate(1))
  g_g = jnp.tanh(gate(2))
  o_g = jax.nn.sigmoid(gate(3))

  c_new = f_g * c0_ref[0].astype(f32) + i_g * g_g
  h_new = o_g * jnp.tanh(c_new)

  h1_ref[0] = h_new.astype(h1_ref.dtype)
  c1_ref[0] = c_new.astype(c1_ref.dtype)

  # Stage this layer's h as the next layer's input (skip on the last layer).
  # Eval-mode nn.Dropout is the identity, which is what is implemented here.
  @pl.when(layer + 1 < num_layers)
  def _():
    hprev_ref[...] = h_new


@functools.partial(jax.jit, static_argnames=("weight_dtype",))
def stacked_lstm_forward(net_input, h_0, c_0, params,
                         weight_dtype=jnp.bfloat16):
  """Mirrors StackedLSTM.forward (eval mode).

  net_input : (batch, input_size)
  h_0, c_0  : (num_layers, batch, rnn_size)
  params    : list of (w_ih (in, 4H), w_hh (H, 4H), bias (4H,)) per layer,
              gate order [i, f, g, o].
  Weights are quantized to `weight_dtype` (bf16 by default) for streaming;
  all accumulation / cell math is float32 inside the kernel.
  Returns (output, (h_1, c_1)).
  """
  batch, input_size = net_input.shape
  num_layers, _, H = h_0.shape
  dtype = net_input.dtype
  c_dtype = c_0.dtype
  xbytes = jnp.dtype(dtype).itemsize
  cbytes = jnp.dtype(c_dtype).itemsize
  wbytes = jnp.dtype(weight_dtype).itemsize

  b_pad = _round_up(batch, 8)
  xrows = _round_up(input_size, 8)
  g4 = _round_up(4 * H, 128)          # packed gate columns [i|f|g|o] + pad

  # ---- Host-side weight packing (bf16 stream, packed gate columns) --------
  w_ih0 = params[0][0].astype(jnp.float32)
  w0 = jnp.zeros((xrows, g4), jnp.float32)
  w0 = w0.at[:input_size, :4 * H].set(w_ih0).astype(weight_dtype)

  w_in_blk, w_hh_blk, b_blk = [], [], []
  for l in range(num_layers):
    w_ih, w_hh, bias = params[l]
    # Layer 0's x contribution is handled by the resident w0 above.
    w_in = (jnp.zeros((H, 4 * H), jnp.float32) if l == 0
            else w_ih.astype(jnp.float32))
    w_in_blk.append(jnp.pad(w_in, ((0, 0), (0, g4 - 4 * H))))
    w_hh_blk.append(jnp.pad(w_hh.astype(jnp.float32),
                            ((0, 0), (0, g4 - 4 * H))))
    b_blk.append(jnp.pad(bias.astype(jnp.float32), (0, g4 - 4 * H))[None, :])
  w_in_stack = jnp.stack(w_in_blk).astype(weight_dtype)   # (L, H, g4)
  w_hh_stack = jnp.stack(w_hh_blk).astype(weight_dtype)   # (L, H, g4)
  b_stack = jnp.stack(b_blk)                               # (L, 1, g4) f32

  x_p = _pad_to(net_input, (b_pad, xrows))
  h0_p = _pad_to(h_0, (num_layers, b_pad, H))
  c0_p = _pad_to(c_0, (num_layers, b_pad, H))              # keep c dtype

  # ---- Generation-aware VMEM budget ----------------------------------------
  try:
    phys_vmem = int(pltpu.get_tpu_info().vmem_capacity_bytes)
  except Exception:
    phys_vmem = 64 * 1024 * 1024        # conservative (v7x-sized) fallback
  vmem_cap = int(phys_vmem * 0.85)      # leave headroom for compiler scratch

  lane = 128
  h_l = _round_up(H, lane)
  x_l = _round_up(xrows, lane)
  vmem_need = (
      2 * b_pad * x_l * xbytes                       # resident x
      + 2 * xrows * g4 * wbytes                      # resident W_ih[0]
      + 2 * 2 * H * g4 * wbytes                      # W_in + W_hh (x2 buffers)
      + 2 * 8 * g4 * 4                               # bias stream
      + 2 * 2 * b_pad * h_l * (xbytes + cbytes)      # h0/c0 in + h1/c1 out
      + b_pad * h_l * 4                              # hprev carry scratch
      + 8 * b_pad * g4 * 4)                          # gate temporaries headroom
  vmem_limit = int(min(vmem_cap, max(4 * vmem_need, 32 * 1024 * 1024)))

  # v7x fallback for large H: if double-buffered weights would crowd VMEM,
  # stream them single-buffered (kernel is DMA-bound; lost overlap is small).
  single_buffer_w = 2 * 2 * H * g4 * wbytes > vmem_cap // 2

  def w_spec():
    if single_buffer_w:
      return pl.BlockSpec((1, H, g4), lambda l: (l, 0, 0),
                          pipeline_mode=pl.Buffered(1))
    return pl.BlockSpec((1, H, g4), lambda l: (l, 0, 0))

  cost = pl.CostEstimate(
      flops=int(2 * num_layers * b_pad * g4 * (2 * H + xrows)),
      transcendentals=int(5 * num_layers * b_pad * H),
      bytes_accessed=int(
          x_p.size * xbytes + w0.size * wbytes
          + w_in_stack.size * wbytes + w_hh_stack.size * wbytes
          + b_stack.size * 4
          + h0_p.size * xbytes + c0_p.size * cbytes
          + num_layers * b_pad * H * (xbytes + cbytes)))   # h1/c1 writes

  grid_spec = pltpu.PrefetchScalarGridSpec(
      num_scalar_prefetch=0,
      grid=(num_layers,),
      in_specs=[
          pl.BlockSpec((b_pad, xrows), lambda l: (0, 0)),     # x (resident)
          pl.BlockSpec((xrows, g4), lambda l: (0, 0)),        # W_ih[0] (resident)
          pl.BlockSpec((1, b_pad, H), lambda l: (l, 0, 0)),   # h_0[l]
          pl.BlockSpec((1, b_pad, H), lambda l: (l, 0, 0)),   # c_0[l]
          w_spec(),                                           # W_in[l]  (bf16)
          w_spec(),                                           # W_hh[l]  (bf16)
          pl.BlockSpec((1, 1, g4), lambda l: (l, 0, 0)),      # bias[l]  (f32)
      ],
      out_specs=[
          pl.BlockSpec((1, b_pad, H), lambda l: (l, 0, 0)),   # h_1[l]
          pl.BlockSpec((1, b_pad, H), lambda l: (l, 0, 0)),   # c_1[l]
      ],
      scratch_shapes=[pltpu.VMEM((b_pad, H), jnp.float32)],   # inter-layer h
  )

  h1_p, c1_p = pl.pallas_call(
      stacked_lstm_kernel,
      out_shape=(
          jax.ShapeDtypeStruct((num_layers, b_pad, H), dtype),
          jax.ShapeDtypeStruct((num_layers, b_pad, H), c_dtype),
      ),
      grid_spec=grid_spec,
      compiler_params=pltpu.CompilerParams(
          # Hidden state carries through scratch -> layer axis is sequential.
          # TODO(synk): add a "parallel" batch-tile axis for v7x when batch>>8.
          dimension_semantics=("arbitrary",),
          vmem_limit_bytes=vmem_limit),
      cost_estimate=cost,
  )(x_p, w0, h0_p, c0_p, w_in_stack, w_hh_stack, b_stack)

  h_1 = h1_p[:, :batch, :]
  c_1 = c1_p[:, :batch, :]
  return h_1[-1], (h_1, c_1)


def make_params(key, num_layers, input_size, rnn_size, dtype=jnp.float32):
  """Deterministic init matching nn.LSTMCell parameter shapes (transposed)."""
  params = []
  in_sz = input_size
  bound = 1.0 / float(jnp.sqrt(jnp.array(rnn_size, dtype=jnp.float32)))
  for _ in range(num_layers):
    key, k1, k2, k3, k4 = jax.random.split(key, 5)
    w_ih = jax.random.uniform(k1, (in_sz, 4 * rnn_size), dtype, -bound, bound)
    w_hh = jax.random.uniform(k2, (rnn_size, 4 * rnn_size), dtype, -bound, bound)
    b_ih = jax.random.uniform(k3, (4 * rnn_size,), dtype, -bound, bound)
    b_hh = jax.random.uniform(k4, (4 * rnn_size,), dtype, -bound, bound)
    params.append((w_ih, w_hh, b_ih + b_hh))
    in_sz = rnn_size
  return params


def reference_forward(net_input, h_0, c_0, params, weight_dtype=jnp.bfloat16):
  """Pure-JAX reference of the same math (same bf16 weight quantization)."""
  H = h_0.shape[-1]
  h_list, c_list = [], []
  x = net_input.astype(jnp.float32)
  for i, (w_ih, w_hh, bias) in enumerate(params):
    w_ih = w_ih.astype(weight_dtype).astype(jnp.float32)
    w_hh = w_hh.astype(weight_dtype).astype(jnp.float32)
    gates = (x @ w_ih + h_0[i].astype(jnp.float32) @ w_hh
             + bias.astype(jnp.float32)[None, :])
    i_g = jax.nn.sigmoid(gates[:, 0 * H:1 * H])
    f_g = jax.nn.sigmoid(gates[:, 1 * H:2 * H])
    g_g = jnp.tanh(gates[:, 2 * H:3 * H])
    o_g = jax.nn.sigmoid(gates[:, 3 * H:4 * H])
    c_i = f_g * c_0[i].astype(jnp.float32) + i_g * g_g
    h_i = o_g * jnp.tanh(c_i)
    x = h_i
    h_list.append(h_i.astype(net_input.dtype))
    c_list.append(c_i.astype(c_0.dtype))
  return x.astype(net_input.dtype), (jnp.stack(h_list), jnp.stack(c_list))


if __name__ == "__main__":
  num_layers = 2
  input_size = 64
  rnn_size = 32
  batch = 8
  # dropout = 0.0 -> eval-mode identity between layers.

  key = jax.random.PRNGKey(0)
  key, kx, kh, kc = jax.random.split(key, 4)
  net_input = jax.random.normal(kx, (batch, input_size), jnp.float32)
  h_0 = jax.random.normal(kh, (num_layers, batch, rnn_size), jnp.float32)
  c_0 = jax.random.normal(kc, (num_layers, batch, rnn_size), jnp.float32)
  params = make_params(key, num_layers, input_size, rnn_size)

  out, (h_1, c_1) = stacked_lstm_forward(net_input, h_0, c_0, params)
  jax.block_until_ready((out, h_1, c_1))

  ref_out, (ref_h, ref_c) = reference_forward(net_input, h_0, c_0, params)
  assert out.shape == (batch, rnn_size)
  assert h_1.shape == (num_layers, batch, rnn_size)
  assert c_1.shape == (num_layers, batch, rnn_size)
  assert jnp.allclose(out, ref_out, atol=1e-4), jnp.abs(out - ref_out).max()
  assert jnp.allclose(h_1, ref_h, atol=1e-4), jnp.abs(h_1 - ref_h).max()
  assert jnp.allclose(c_1, ref_c, atol=1e-4), jnp.abs(c_1 - ref_c).max()

  print("KERNEL_OK")
</pallas_src>

<mosaic_0001>
module attributes {stable_mosaic.version = 11 : i64} {
  func.func @stacked_lstm_kernel(%arg0: i32, %arg1: memref<8x64xf32, #tpu.memory_space<vmem>>, %arg2: memref<64x128xbf16, #tpu.memory_space<vmem>>, %arg3: memref<1x8x32xf32, #tpu.memory_space<vmem>>, %arg4: memref<1x8x32xf32, #tpu.memory_space<vmem>>, %arg5: memref<1x32x128xbf16, #tpu.memory_space<vmem>>, %arg6: memref<1x32x128xbf16, #tpu.memory_space<vmem>>, %arg7: memref<1x1x128xf32, #tpu.memory_space<vmem>>, %arg8: memref<1x8x32xf32, #tpu.memory_space<vmem>>, %arg9: memref<1x8x32xf32, #tpu.memory_space<vmem>>, %arg10: memref<8x32xf32, #tpu.memory_space<vmem>>) attributes {dimension_semantics = [#tpu.dimension_semantics<arbitrary>], iteration_bounds = array<i64: 2>, scalar_prefetch = 0 : i64, scratch_operands = 1 : i64, tpu.core_type = #tpu.core_type<tc>, window_params = [{pipeline_mode = #tpu.pipeline_mode<synchronous>, transform_indices = @transform_0, window_bounds = array<i64: 8, 64>}, {pipeline_mode = #tpu.pipeline_mode<synchronous>, transform_indices = @transform_1, window_bounds = array<i64: 64, 128>}, {transform_indices = @transform_2, window_bounds = array<i64: 1, 8, 32>}, {transform_indices = @transform_3, window_bounds = array<i64: 1, 8, 32>}, {transform_indices = @transform_4, window_bounds = array<i64: 1, 32, 128>}, {transform_indices = @transform_5, window_bounds = array<i64: 1, 32, 128>}, {transform_indices = @transform_6, window_bounds = array<i64: 1, 1, 128>}, {transform_indices = @transform_7, window_bounds = array<i64: 1, 8, 32>}, {transform_indices = @transform_8, window_bounds = array<i64: 1, 8, 32>}]} {
    %c0_i32 = arith.constant 0 : i32
    %0 = arith.cmpi eq, %arg0, %c0_i32 : i32
    %1 = arith.extui %0 : i1 to i32
    %c0_i32_0 = arith.constant 0 : i32
    %2 = arith.cmpi ne, %1, %c0_i32_0 : i32
    scf.if %2 {
      %cst_39 = arith.constant 0.000000e+00 : f32
      %88 = vector.broadcast %cst_39 : f32 to vector<8x32xf32>
      %c0_40 = arith.constant 0 : index
      %c0_41 = arith.constant 0 : index
      %89 = vector.load %arg10[%c0_40, %c0_41] : memref<8x32xf32, #tpu.memory_space<vmem>>, vector<8x32xf32>
      tpu.vector_store %arg10[%c0_40, %c0_41], %88 {strides = array<i32>} : memref<8x32xf32, #tpu.memory_space<vmem>>, vector<8x32xf32>,
    } else {
    }
    %c0_i32_1 = arith.constant 0 : i32
    %3 = arith.cmpi eq, %arg0, %c0_i32_1 : i32
    %4 = arith.extui %3 : i1 to i32
    %5 = arith.sitofp %4 : i32 to f32
    %c0 = arith.constant 0 : index
    %c0_2 = arith.constant 0 : index
    %6 = vector.load %arg1[%c0, %c0_2] : memref<8x64xf32, #tpu.memory_space<vmem>>, vector<8x64xf32>
    %c0_3 = arith.constant 0 : index
    %c0_4 = arith.constant 0 : index
    %7 = vector.load %arg2[%c0_3, %c0_4] : memref<64x128xbf16, #tpu.memory_space<vmem>>, vector<64x128xbf16>
    %8 = arith.extf %7 : vector<64x128xbf16> to vector<64x128xf32>
    %cst = arith.constant dense<0.000000e+00> : vector<8x128xf32>
    %9 = tpu.matmul %6, %8, %cst {dimension_numbers = #tpu.dot_dimension_numbers<[1], [0], [0], [1], [0, 0, 1, 1], [], []>} : vector<8x64xf32>, vector<64x128xf32>, vector<8x128xf32> -> vector<8x128xf32>
    %10 = vector.broadcast %5 : f32 to vector<8x128xf32>
    %11 = arith.mulf %10, %9 : vector<8x128xf32>
    %c0_5 = arith.constant 0 : index
    %c0_6 = arith.constant 0 : index
    %12 = vector.load %arg10[%c0_5, %c0_6] : memref<8x32xf32, #tpu.memory_space<vmem>>, vector<8x32xf32>
    %c0_7 = arith.constant 0 : index
    %c0_8 = arith.constant 0 : index
    %c0_9 = arith.constant 0 : index
    %13 = vector.load %arg5[%c0_7, %c0_8, %c0_9] : memref<1x32x128xbf16, #tpu.memory_space<vmem>>, vector<1x32x128xbf16>
    %14 = vector.shape_cast %13 : vector<1x32x128xbf16> to vector<32x128xbf16>
    %15 = arith.extf %14 : vector<32x128xbf16> to vector<32x128xf32>
    %cst_10 = arith.constant dense<0.000000e+00> : vector<8x128xf32>
    %16 = tpu.matmul %12, %15, %cst_10 {dimension_numbers = #tpu.dot_dimension_numbers<[1], [0], [0], [1], [0, 0, 1, 1], [], []>} : vector<8x32xf32>, vector<32x128xf32>, vector<8x128xf32> -> vector<8x128xf32>
    %17 = arith.addf %11, %16 : vector<8x128xf32>
    %c0_11 = arith.constant 0 : index
    %c0_12 = arith.constant 0 : index
    %c0_13 = arith.constant 0 : index
    %18 = vector.load %arg3[%c0_11, %c0_12, %c0_13] : memref<1x8x32xf32, #tpu.memory_space<vmem>>, vector<1x8x32xf32>
    %19 = vector.shape_cast %18 : vector<1x8x32xf32> to vector<8x32xf32>
    %c0_14 = arith.constant 0 : index
    %c0_15 = arith.constant 0 : index
    %c0_16 = arith.constant 0 : index
    %20 = vector.load %arg6[%c0_14, %c0_15, %c0_16] : memref<1x32x128xbf16, #tpu.memory_space<vmem>>, vector<1x32x128xbf16>
    %21 = vector.shape_cast %20 : vector<1x32x128xbf16> to vector<32x128xbf16>
    %22 = arith.extf %21 : vector<32x128xbf16> to vector<32x128xf32>
    %cst_17 = arith.constant dense<0.000000e+00> : vector<8x128xf32>
    %23 = tpu.matmul %19, %22, %cst_17 {dimension_numbers = #tpu.dot_dimension_numbers<[1], [0], [0], [1], [0, 0, 1, 1], [], []>} : vector<8x32xf32>, vector<32x128xf32>, vector<8x128xf32> -> vector<8x128xf32>
    %24 = arith.addf %17, %23 : vector<8x128xf32>
    %c0_18 = arith.constant 0 : index
    %c0_19 = arith.constant 0 : index
    %c0_20 = arith.constant 0 : index
    %25 = vector.load %arg7[%c0_18, %c0_19, %c0_20] : memref<1x1x128xf32, #tpu.memory_space<vmem>>, vector<1x1x128xf32>
    %26 = vector.shape_cast %25 : vector<1x1x128xf32> to vector<1x128xf32>
    %27 = vector.broadcast %26 : vector<1x128xf32> to vector<8x128xf32>
    %28 = arith.addf %24, %27 : vector<8x128xf32>
    %29 = tpu.iota {dimensions = array<i32: 0>} : vector<128x32xi32>
    %30 = tpu.iota {dimensions = array<i32: 1>} : vector<128x32xi32>
    %c0_i32_21 = arith.constant 0 : i32
    %31 = vector.broadcast %c0_i32_21 : i32 to vector<128x32xi32>
    %32 = arith.addi %30, %31 : vector<128x32xi32>
    %33 = arith.cmpi eq, %29, %32 : vector<128x32xi32>
    %34 = arith.extui %33 : vector<128x32xi1> to vector<128x32xi32>
    %35 = arith.sitofp %34 : vector<128x32xi32> to vector<128x32xf32>
    %cst_22 = arith.constant dense<0.000000e+00> : vector<8x32xf32>
    %36 = tpu.matmul %28, %35, %cst_22 {dimension_numbers = #tpu.dot_dimension_numbers<[1], [0], [0], [1], [0, 0, 1, 1], [], []>} : vector<8x128xf32>, vector<128x32xf32>, vector<8x32xf32> -> vector<8x32xf32>
    %37 = arith.negf %36 : vector<8x32xf32>
    %38 = math.exp %37 : vector<8x32xf32>
    %cst_23 = arith.constant 1.000000e+00 : f32
    %39 = vector.broadcast %cst_23 : f32 to vector<8x32xf32>
    %40 = arith.addf %39, %38 : vector<8x32xf32>
    %41 = arith.divf %39, %40 : vector<8x32xf32>
    %c32_i32 = arith.constant 32 : i32
    %42 = vector.broadcast %c32_i32 : i32 to vector<128x32xi32>
    %43 = arith.addi %30, %42 : vector<128x32xi32>
    %44 = arith.cmpi eq, %29, %43 : vector<128x32xi32>
    %45 = arith.extui %44 : vector<128x32xi1> to vector<128x32xi32>
    %46 = arith.sitofp %45 : vector<128x32xi32> to vector<128x32xf32>
    %cst_24 = arith.constant dense<0.000000e+00> : vector<8x32xf32>
    %47 = tpu.matmul %28, %46, %cst_24 {dimension_numbers = #tpu.dot_dimension_numbers<[1], [0], [0], [1], [0, 0, 1, 1], [], []>} : vector<8x128xf32>, vector<128x32xf32>, vector<8x32xf32> -> vector<8x32xf32>
    %48 = arith.negf %47 : vector<8x32xf32>
    %49 = math.exp %48 : vector<8x32xf32>
    %cst_25 = arith.constant 1.000000e+00 : f32
    %50 = vector.broadcast %cst_25 : f32 to vector<8x32xf32>
    %51 = arith.addf %50, %49 : vector<8x32xf32>
    %52 = arith.divf %50, %51 : vector<8x32xf32>
    %c64_i32 = arith.constant 64 : i32
    %53 = vector.broadcast %c64_i32 : i32 to vector<128x32xi32>
    %54 = arith.addi %30, %53 : vector<128x32xi32>
    %55 = arith.cmpi eq, %29, %54 : vector<128x32xi32>
    %56 = arith.extui %55 : vector<128x32xi1> to vector<128x32xi32>
    %57 = arith.sitofp %56 : vector<128x32xi32> to vector<128x32xf32>
    %cst_26 = arith.constant dense<0.000000e+00> : vector<8x32xf32>
    %58 = tpu.matmul %28, %57, %cst_26 {dimension_numbers = #tpu.dot_dimension_numbers<[1], [0], [0], [1], [0, 0, 1, 1], [], []>} : vector<8x128xf32>, vector<128x32xf32>, vector<8x32xf32> -> vector<8x32xf32>
    %59 = math.tanh %58 : vector<8x32xf32>
    %c96_i32 = arith.constant 96 : i32
    %60 = vector.broadcast %c96_i32 : i32 to vector<128x32xi32>
    %61 = arith.addi %30, %60 : vector<128x32xi32>
    %62 = arith.cmpi eq, %29, %61 : vector<128x32xi32>
    %63 = arith.extui %62 : vector<128x32xi1> to vector<128x32xi32>
    %64 = arith.sitofp %63 : vector<128x32xi32> to vector<128x32xf32>
    %cst_27 = arith.constant dense<0.000000e+00> : vector<8x32xf32>
    %65 = tpu.matmul %28, %64, %cst_27 {dimension_numbers = #tpu.dot_dimension_numbers<[1], [0], [0], [1], [0, 0, 1, 1], [], []>} : vector<8x128xf32>, vector<128x32xf32>, vector<8x32xf32> -> vector<8x32xf32>
    %66 = arith.negf %65 : vector<8x32xf32>
    %67 = math.exp %66 : vector<8x32xf32>
    %cst_28 = arith.constant 1.000000e+00 : f32
    %68 = vector.broadcast %cst_28 : f32 to vector<8x32xf32>
    %69 = arith.addf %68, %67 : vector<8x32xf32>
    %70 = arith.divf %68, %69 : vector<8x32xf32>
    %c0_29 = arith.constant 0 : index
    %c0_30 = arith.constant 0 : index
    %c0_31 = arith.constant 0 : index
    %71 = vector.load %arg4[%c0_29, %c0_30, %c0_31] : memref<1x8x32xf32, #tpu.memory_space<vmem>>, vector<1x8x32xf32>
    %72 = vector.shape_cast %71 : vector<1x8x32xf32> to vector<8x32xf32>
    %73 = arith.mulf %52, %72 : vector<8x32xf32>
    %74 = arith.mulf %41, %59 : vector<8x32xf32>
    %75 = arith.addf %73, %74 : vector<8x32xf32>
    %76 = math.tanh %75 : vector<8x32xf32>
    %77 = arith.mulf %70, %76 : vector<8x32xf32>
    %c0_32 = arith.constant 0 : index
    %c0_33 = arith.constant 0 : index
    %c0_34 = arith.constant 0 : index
    %78 = vector.load %arg8[%c0_32, %c0_33, %c0_34] : memref<1x8x32xf32, #tpu.memory_space<vmem>>, vector<1x8x32xf32>
    %79 = vector.shape_cast %78 : vector<1x8x32xf32> to vector<8x32xf32>
    %80 = vector.shape_cast %77 : vector<8x32xf32> to vector<1x8x32xf32>
    tpu.vector_store %arg8[%c0_32, %c0_33, %c0_34], %80 {strides = array<i32>} : memref<1x8x32xf32, #tpu.memory_space<vmem>>, vector<1x8x32xf32>,
    %c0_35 = arith.constant 0 : index
    %c0_36 = arith.constant 0 : index
    %c0_37 = arith.constant 0 : index
    %81 = vector.load %arg9[%c0_35, %c0_36, %c0_37] : memref<1x8x32xf32, #tpu.memory_space<vmem>>, vector<1x8x32xf32>
    %82 = vector.shape_cast %81 : vector<1x8x32xf32> to vector<8x32xf32>
    %83 = vector.shape_cast %75 : vector<8x32xf32> to vector<1x8x32xf32>
    tpu.vector_store %arg9[%c0_35, %c0_36, %c0_37], %83 {strides = array<i32>} : memref<1x8x32xf32, #tpu.memory_space<vmem>>, vector<1x8x32xf32>,
    %c1_i32 = arith.constant 1 : i32
    %84 = arith.addi %arg0, %c1_i32 : i32
    %c2_i32 = arith.constant 2 : i32
    %85 = arith.cmpi slt, %84, %c2_i32 : i32
    %86 = arith.extui %85 : i1 to i32
    %c0_i32_38 = arith.constant 0 : i32
    %87 = arith.cmpi ne, %86, %c0_i32_38 : i32
    scf.if %87 {
      %c0_39 = arith.constant 0 : index
      %c0_40 = arith.constant 0 : index
      %88 = vector.load %arg10[%c0_39, %c0_40] : memref<8x32xf32, #tpu.memory_space<vmem>>, vector<8x32xf32>
      tpu.vector_store %arg10[%c0_39, %c0_40], %77 {strides = array<i32>} : memref<8x32xf32, #tpu.memory_space<vmem>>, vector<8x32xf32>,
    } else {
    }
    return
  }
  func.func @transform_0(%arg0: i32) -> (i32, i32) {
    %c0_i32 = arith.constant 0 : i32
    %c0_i32_0 = arith.constant 0 : i32
    %c0_i32_1 = arith.constant 0 : i32
    return %c0_i32, %c0_i32_0 : i32, i32
  }
  func.func @transform_1(%arg0: i32) -> (i32, i32) {
    %c0_i32 = arith.constant 0 : i32
    %c0_i32_0 = arith.constant 0 : i32
    %c0_i32_1 = arith.constant 0 : i32
    return %c0_i32, %c0_i32_0 : i32, i32
  }
  func.func @transform_2(%arg0: i32) -> (i32, i32, i32) {
    %c0_i32 = arith.constant 0 : i32
    %c0_i32_0 = arith.constant 0 : i32
    %c0_i32_1 = arith.constant 0 : i32
    return %arg0, %c0_i32, %c0_i32_0 : i32, i32, i32
  }
  func.func @transform_3(%arg0: i32) -> (i32, i32, i32) {
    %c0_i32 = arith.constant 0 : i32
    %c0_i32_0 = arith.constant 0 : i32
    %c0_i32_1 = arith.constant 0 : i32
    return %arg0, %c0_i32, %c0_i32_0 : i32, i32, i32
  }
  func.func @transform_4(%arg0: i32) -> (i32, i32, i32) {
    %c0_i32 = arith.constant 0 : i32
    %c0_i32_0 = arith.constant 0 : i32
    %c0_i32_1 = arith.constant 0 : i32
    return %arg0, %c0_i32, %c0_i32_0 : i32, i32, i32
  }
  func.func @transform_5(%arg0: i32) -> (i32, i32, i32) {
    %c0_i32 = arith.constant 0 : i32
    %c0_i32_0 = arith.constant 0 : i32
    %c0_i32_1 = arith.constant 0 : i32
    return %arg0, %c0_i32, %c0_i32_0 : i32, i32, i32
  }
  func.func @transform_6(%arg0: i32) -> (i32, i32, i32) {
    %c0_i32 = arith.constant 0 : i32
    %c0_i32_0 = arith.constant 0 : i32
    %c0_i32_1 = arith.constant 0 : i32
    return %arg0, %c0_i32, %c0_i32_0 : i32, i32, i32
  }
  func.func @transform_7(%arg0: i32) -> (i32, i32, i32) {
    %c0_i32 = arith.constant 0 : i32
    %c0_i32_0 = arith.constant 0 : i32
    %c0_i32_1 = arith.constant 0 : i32
    return %arg0, %c0_i32, %c0_i32_0 : i32, i32, i32
  }
  func.func @transform_8(%arg0: i32) -> (i32, i32, i32) {
    %c0_i32 = arith.constant 0 : i32
    %c0_i32_0 = arith.constant 0 : i32
    %c0_i32_1 = arith.constant 0 : i32
    return %arg0, %c0_i32, %c0_i32_0 : i32, i32, i32
  }
}

</mosaic_0001>

<bundles_post_ra>
// kernel: stacked_lstm_forward.1
= control target key start
LH: loop header
LB: loop body
LE: loop exit
PB: predicated region body
PF: predicated region fallthrough
CT: control target
= control target key end

     0   :  { %s2353_s0 = inlined_call_operand.vmem [shape: f32[8,64], index: 0, kind: input, shape index: {}]   ;;  %s2354_s1 = inlined_call_operand.vmem [shape: bf16[64,128], index: 1, kind: input, shape index: {}]   ;;  %s2355_s2 = inlined_call_operand.vmem [shape: f32[2,8,32], index: 2, kind: input, shape index: {}]   ;;  %s2356_s3 = inlined_call_operand.vmem [shape: f32[2,8,32], index: 3, kind: input, shape index: {}]   ;;  %s2357_s4 = inlined_call_operand.vmem [shape: bf16[2,32,128], index: 4, kind: input, shape index: {}]   ;;  %s2358_s5 = inlined_call_operand.vmem [shape: bf16[2,32,128], index: 5, kind: input, shape index: {}]   ;;  %s2359_s6 = inlined_call_operand.vmem [shape: f32[2,1,128], index: 6, kind: input, shape index: {}]   ;;  %s2360_s7 = inlined_call_operand.vmem [shape: f32[2,8,32], index: 7, kind: output, shape index: {0}]   ;;  %s2361_s8 = inlined_call_operand.hbm [shape: f32[2,8,32], index: 8, kind: output, shape index: {1}]  }
   0x1   :  { %2370 = sst [smem:[#allocation12_spill]] %s2361_s8 }
   0x2   :  { %14 = vsyncpa [#allocation4], 0 }
   0x3   :  { %16 = vsyncpa [#allocation4 + $0x1], 0  ;;  %s1918_s27 = smov 0   ;;  %s1920_s28 = smov 0  }
   0x4   :  { %s1922_s29 = smov 0   ;;  %s1924_s30 = smov 0  }
   0x5 LB: > { %2371 = sst [smem:[#allocation6_spill]] %s1854_s27  ;;  %s1939_s9 = sadd.s32 4294967295, %s1866_s30   ;;  %s1866_s30 = sphi %s1924_s30, %s2385_s30   ;;  %s1862_s29 = sphi %s1922_s29, %s2387_s29   ;;  %s1858_s28 = sphi %s1920_s28, %s2389_s28   ;;  %s1854_s27 = sphi %s1918_s27, %s2388_s27  }
   0x6   : > { %2372 = sst [smem:[#allocation7_spill]] %s1862_s29  ;;  %s1335_s10 = sadd.s32 4294967294, %s1866_s30  }
   0x7   : > { %2373 = sst [smem:[#allocation8_spill]] %s1866_s30  ;;  %s1943_s11 = sadd.s32 1, %s1866_s30  }
   0x8   : > { %2374 = sst [smem:[#allocation9_spill]] %s1943_s11  ;;  %s227_s12 = sadd.s32 1, %s1862_s29 }
   0x9   : > { %s224_s13 = ssub.s32 %s1866_s30, %s1943_s11  ;;  %p237_p0 = scmp.ne.s32.totalorder %s1862_s29, %s1858_s28 }
   0xa   : > { %p225_p1 = scmp.eq.s32.totalorder %s224_s13, 0  ;;  %p238_p2 = scmp.eq.s32.totalorder %s1939_s9, 1 }
   0xb   : > { %p243_p3 = scmp.ne.s32.totalorder %s1858_s28, %s1854_s27  ;;  %p244_p4 = scmp.eq.s32.totalorder %s1335_s10, 1 }
   0xc   : > { %s1954_s14 = scalar_select %p225_p1, %s1862_s29, %s227_s12  }
   0xd   : > { %p1956_p5 = por %p238_p2, %p237_p0  ;;  %p1960_p6 = por %p244_p4, %p243_p3 }
   0xe   : > { %2375 = sst [smem:[#allocation10_spill]] %s1954_s14  ;;  %p1338_p7 = scmp.ge.s32.totalorder %s1866_s30, 1 }
   0xf   : > { %s2377_s16 = scalar_select %p1960_p6, 1, 0 }
  0x10   : > { %p304_p8 = scmp.lt.s32.totalorder %s1866_s30, 3 }
  0x11   : > { %2378 = sst [smem:[#allocation11_spill]] %s2377_s16 }
  0x12   : > { %p305_p9 = pnand %p1338_p7, %p304_p8 }
  0x13   : > { %s2362_s17 = sand.u32 (!%p305_p9), 1, %s1858_s28   ;;  %p358_p10 = scmp.lt.s32.totalorder (!%p305_p9), %s1939_s9, 1 }
  0x14   : > { %308 = sbr.rel (%p305_p9) target bundleno = 540 (0x21c), region = 48  ;;  %s1970_s18 = sshll.u32 (!%p305_p9), %s2362_s17, 3 }
  0x15   : > { %p383_p11 = scmp.eq.s32.totalorder (!%p305_p9), %s1939_s9, 0  ;;  %s357_s24 = scalar_lea.vmem (!%p305_p9), [#allocation3], %s1970_s18 }
  0x16   : > { %p1347_p12 = scmp.ne.s32.totalorder (!%p305_p9), %s1939_s9, 0 }
  0x19   : > { %s1974_s19 = scalar_select %p358_p10, %s1939_s9, 1 }
  0x1a   : > { %386 = sbr.rel (%p1347_p12) target bundleno = 33 (0x21), region = 52 }
  0x1b   : > { %s1977_s20 = sshll.u32 %s1974_s19, 3  ;;  %s1440_s21 = sshll.u32 %s1974_s19, 4 }
  0x1c   : > { %s365_s10 = scalar_lea.vmem %s2356_s3, %s1977_s20  ;;  %s370_s17 = scalar_lea.vmem %s2357_s4, %s1440_s21 }
  0x1d   : > { %s1994_s11 = scalar_lea.vmem %s2358_s5, %s1440_s21  ;;  %s378_s30 = scalar_lea.vmem %s2359_s6, %s1974_s19 }
  0x1e   : > { %s382_s23 = scalar_lea.vmem %s2360_s7, %s1977_s20 }
  0x1f   : > { %vm387_vm0 = vcmask 261120   ;;  %v1868_v0 = vmov 0.0  }
  0x20   : > { %388 = vst.msk [vmem:[#allocation2] sm:$0xff] %vm387_vm0, %v1868_v0 }
  0x21 PF: > { %v1476_v1 = vld [vmem:[%s2354_s1 + $0x18] sm:$0xff]   ;;  %v1477_v2 = vld [vmem:[%s370_s17 + $0x8] sm:$0xff]   ;;  %v1475_v3 = vld [vmem:[%s2354_s1 + $0x10] sm:$0xff]   ;;  %v1869_v4 = vmov 0.0   ;;  %vm1870_vm1 = vmmov 0   ;;  %v659_v16 = vlaneseq  ;;  %vm493_vm2 = vcmask 261120   ;;  %s2379_s22 = scalar_lea.vmem %s2355_s2, %s1977_s20 }
  0x22   : > { %1566 = vmatprep.subr.mxu0 %v1869_v4  ;;  %v1456_v5 = vunpack.c.l.bf16 %v1476_v1  ;;  %v1457_v6 = vunpack.c.h.bf16 %v1476_v1  ;;  %1585 = vmatprep.subr.mxu1 %v1869_v4  ;;  %v1464_v7 = vunpack.c.l.bf16 %v1477_v2  ;;  %v1465_v8 = vunpack.c.h.bf16 %v1477_v2  ;;  %v1459_v9 = vld [vmem:[%s370_s17] sm:$0xff]   ;;  %v1474_v12 = vld [vmem:[%s2354_s1 + $0x8] sm:$0xff]   ;;  %s389_s25 = scalar_select %p383_p11, 1, 0 }
  0x23   : > { %1593 = vmatprep.mubr.msk.f32.mxu1 %vm1870_vm1, %v1869_v4  ;;  %1582 = vmatprep.mubr.msk.f32.mxu0 %vm1870_vm1, %v1869_v4  ;;  %v1453_v10 = vunpack.c.h.bf16 %v1475_v3  ;;  %v1461_v11 = vunpack.c.h.bf16 %v1459_v9  ;;  %v1452_v13 = vunpack.c.l.bf16 %v1475_v3  ;;  %v1460_v14 = vunpack.c.l.bf16 %v1459_v9  ;;  %v1478_v15 = vld [vmem:[%s1994_s11 + $0x8] sm:$0xff]   ;;  %v1443_v20 = vld [vmem:[%s2354_s1] sm:$0xff]  }
  0x24   : > { %1567 = vmatpush3.msra.mxu0 %v1457_v6  ;;  %1586 = vmatpush3.msra.mxu1 %v1465_v8  ;;  %v1449_v17 = vunpack.c.h.bf16 %v1474_v12  ;;  %v1473_v19 = vunpack.c.h.bf16 %v1478_v15  ;;  %v1448_v21 = vunpack.c.l.bf16 %v1474_v12  ;;  %v1467_v22 = vld [vmem:[%s1994_s11] sm:$0xff]   ;;  %v1472_v23 = vunpack.c.l.bf16 %v1478_v15  ;;  %s390_s29 = scvt.s32.f32 %s389_s25 }
  0x25   : > { %1568 = vmatprep.subr.mxu0 %v1869_v4  ;;  %1587 = vmatprep.subr.mxu1 %v1869_v4  ;;  %v2034_v24 = vshrl.u32 %v659_v16, 7  ;;  %v2036_v25 = vand.u32 127, %v659_v16  ;;  %v1445_v26 = vunpack.c.h.bf16 %v1443_v20  ;;  %v1469_v27 = vunpack.c.h.bf16 %v1467_v22  ;;  %v391_v32 = vld [vmem:[%s2353_s0] sm:$0xff] }
  0x26   : > { %1569 = vmatpush3.msra.mxu0 %v1456_v5  ;;  %1588 = vmatpush3.msra.mxu1 %v1464_v7  ;;  %v1444_v28 = vunpack.c.l.bf16 %v1443_v20  ;;  %v1468_v29 = vunpack.c.l.bf16 %v1467_v22  ;;  %vm408_vm3 = vcmask 523264   ;;  %v568_v34 = vld [vmem:[%s2379_s22] sm:$0xff]  ;;  %v1871_v37 = vmov 1.0  }
  0x27   : > { %1570 = vmatprep.subr.mxu0 %v1869_v4  ;;  %1589 = vmatprep.subr.mxu1 %v1869_v4  ;;  %v484_v18 = vld [vmem:[#allocation2] sm:$0xff]  ;;  %v2043_v30 = vadd.s32 120, %v2034_v24  ;;  %v2046_v31 = vadd.s32 32, %v2036_v25  ;;  %v2054_v33 = vadd.s32 112, %v2034_v24  ;;  %v2067_v35 = vadd.s32 104, %v2034_v24 }
  0x28   : > { %1571 = vmatpush3.msra.mxu0 %v1453_v10  ;;  %1590 = vmatpush3.msra.mxu1 %v1461_v11  ;;  %v2079_v36 = vadd.s32 96, %v2034_v24  ;;  %v2090_v38 = vadd.s32 88, %v2034_v24  ;;  %v2101_v39 = vadd.s32 80, %v2034_v24  ;;  %v2112_v40 = vadd.s32 72, %v2034_v24  ;;  %v1351_v59 = vld [vmem:[%s378_s30] ss:$0 sm:$0xff] }
  0x29   : > { %1572 = vmatprep.subr.mxu0 %v1869_v4  ;;  %1591 = vmatprep.subr.mxu1 %v1869_v4  ;;  %vm693_vm4 = vcmp.eq.s32.totalorder %v2043_v30, %v2036_v25  ;;  %vm818_vm5 = vcmp.eq.s32.totalorder %v2043_v30, %v2046_v31  ;;  %vm692_vm6 = vcmp.eq.s32.totalorder %v2054_v33, %v2036_v25  ;;  %v2123_v41 = vadd.s32 64, %v2034_v24  ;;  %s1180_s30 = sadd.s32 1, %s1939_s9  ;;  %v1172_v15 = vld [vmem:[%s365_s10] sm:$0xff] }
  0x2a   : > { %1573 = vmatpush3.msra.mxu0 %v1452_v13  ;;  %1592 = vmatpush3.msra.mxu1 %v1460_v14  ;;  %vm817_vm7 = vcmp.eq.s32.totalorder %v2054_v33, %v2046_v31  ;;  %vm691_vm8 = vcmp.eq.s32.totalorder %v2067_v35, %v2036_v25  ;;  %vm816_vm9 = vcmp.eq.s32.totalorder %v2067_v35, %v2046_v31  ;;  %v667_v42 = vadd.s32 56, %v2034_v24  ;;  %p1435_p13 = scmp.ge.s32.totalorder %s1180_s30, 2 }
  0x2b   : > { %1574 = vmatprep.subr.mxu0 %v1869_v4  ;;  %1596 = vmatprep.subr.mxu1 %v1869_v4  ;;  %vm690_vm10 = vcmp.eq.s32.totalorder %v2079_v36, %v2036_v25  ;;  %vm815_vm11 = vcmp.eq.s32.totalorder %v2079_v36, %v2046_v31  ;;  %vm689_vm12 = vcmp.eq.s32.totalorder %v2090_v38, %v2036_v25  ;;  %v666_v43 = vadd.s32 48, %v2034_v24 }
  0x2c   : > { %1575 = vmatpush3.msra.mxu0 %v1449_v17  ;;  %1594 = vmatmul.mubr.msk.f32.vlgmr.msra.gmra.mxu1 %vm493_vm2, %v484_v18  ;;  %vm814_vm13 = vcmp.eq.s32.totalorder %v2090_v38, %v2046_v31  ;;  %vm688_vm14 = vcmp.eq.s32.totalorder %v2101_v39, %v2036_v25  ;;  %vm813_vm15 = vcmp.eq.s32.totalorder %v2101_v39, %v2046_v31  ;;  %v665_v44 = vadd.s32 40, %v2034_v24 }
  0x2d   : > { %1576 = vmatprep.subr.mxu0 %v1869_v4  ;;  %1597 = vmatpush3.msra.mxu1 %v1473_v19  ;;  %vm687_vm0 = vcmp.eq.s32.totalorder %v2112_v40, %v2036_v25  ;;  %v664_v45 = vadd.s32 32, %v2034_v24  ;;  %v663_v46 = vadd.s32 24, %v2034_v24  ;;  %v662_v47 = vadd.s32 16, %v2034_v24 }
  0x2e   : > { %1577 = vmatpush3.msra.mxu0 %v1448_v21  ;;  %1598 = vmatprep.subr.mxu1 %v1869_v4  ;;  %v661_v48 = vadd.s32 8, %v2034_v24  ;;  %v482_v51 = vstv %s390_s29  ;;  %v927_v57 = vadd.s32 64, %v2036_v25  ;;  %v1047_v58 = vadd.s32 96, %v2036_v25 }
  0x2f   : > { %1578 = vmatprep.subr.mxu0 %v1869_v4  ;;  %1599 = vmatpush3.msra.mxu1 %v1472_v23 }
  0x30   : > { %1579 = vmatpush3.msra.mxu0 %v1445_v26  ;;  %1600 = vmatprep.subr.mxu1 %v1869_v4 }
  0x31   : > { %1580 = vmatprep.subr.mxu0 %v1869_v4  ;;  %1601 = vmatpush3.msra.mxu1 %v1469_v27 }
  0x32   : > { %1581 = vmatpush3.msra.mxu0 %v1444_v28  ;;  %1602 = vmatprep.subr.mxu1 %v1869_v4 }
  0x33   : > { %1583 = vmatmul.mubr.msk.f32.vlgmr.msra.gmra.mxu0 %vm408_vm3, %v391_v32  ;;  %1603 = vmatpush3.msra.mxu1 %v1468_v29  ;;  %vm812_vm3 = vcmp.eq.s32.totalorder %v2112_v40, %v2046_v31 }
  0x34   : > { %1604 = vmatprep.mubr.msk.f32.mxu1 %vm1870_vm1, %v1869_v4  ;;  %1607 = vmatprep.subr.mxu0 %v1869_v4 }
  0x35   : > { %1605 = vmatmul.mubr.msk.f32.vlgmr.msra.gmra.mxu1 %vm493_vm2, %v568_v34  ;;  %1642 = vmatprep.subr.mxu1 %v1869_v4 }
  0x36   : > { %1608 = vmatpush3.msk.msra.mxu0 %vm693_vm4, %v1871_v37  ;;  %1643 = vmatpush3.msk.msra.mxu1 %vm818_vm5, %v1871_v37  ;;  %vm686_vm4 = vcmp.eq.s32.totalorder %v2123_v41, %v2036_v25  ;;  %vm811_vm5 = vcmp.eq.s32.totalorder %v2123_v41, %v2046_v31 }
  0x37   : > { %1609 = vmatprep.subr.mxu0 %v1869_v4  ;;  %1644 = vmatprep.subr.mxu1 %v1869_v4 }
  0x38   : > { %1610 = vmatpush3.msk.msra.mxu0 %vm692_vm6, %v1871_v37  ;;  %1645 = vmatpush3.msk.msra.mxu1 %vm817_vm7, %v1871_v37  ;;  %vm685_vm6 = vcmp.eq.s32.totalorder %v667_v42, %v2036_v25  ;;  %vm810_vm7 = vcmp.eq.s32.totalorder %v667_v42, %v2046_v31 }
  0x39   : > { %1611 = vmatprep.subr.mxu0 %v1869_v4  ;;  %1646 = vmatprep.subr.mxu1 %v1869_v4 }
  0x3a   : > { %1612 = vmatpush3.msk.msra.mxu0 %vm691_vm8, %v1871_v37  ;;  %1647 = vmatpush3.msk.msra.mxu1 %vm816_vm9, %v1871_v37  ;;  %vm684_vm8 = vcmp.eq.s32.totalorder %v666_v43, %v2036_v25  ;;  %vm809_vm9 = vcmp.eq.s32.totalorder %v666_v43, %v2046_v31 }
  0x3b   : > { %1613 = vmatprep.subr.mxu0 %v1869_v4  ;;  %1648 = vmatprep.subr.mxu1 %v1869_v4 }
  0x3c   : > { %1614 = vmatpush3.msk.msra.mxu0 %vm690_vm10, %v1871_v37  ;;  %1649 = vmatpush3.msk.msra.mxu1 %vm815_vm11, %v1871_v37  ;;  %vm683_vm10 = vcmp.eq.s32.totalorder %v665_v44, %v2036_v25  ;;  %vm808_vm11 = vcmp.eq.s32.totalorder %v665_v44, %v2046_v31 }
  0x3d   : > { %1615 = vmatprep.subr.mxu0 %v1869_v4  ;;  %1650 = vmatprep.subr.mxu1 %v1869_v4 }
  0x3e   : > { %1616 = vmatpush3.msk.msra.mxu0 %vm689_vm12, %v1871_v37  ;;  %1651 = vmatpush3.msk.msra.mxu1 %vm814_vm13, %v1871_v37  ;;  %vm682_vm12 = vcmp.eq.s32.totalorder %v664_v45, %v2036_v25  ;;  %vm807_vm13 = vcmp.eq.s32.totalorder %v664_v45, %v2046_v31 }
  0x3f   : > { %1617 = vmatprep.subr.mxu0 %v1869_v4  ;;  %1652 = vmatprep.subr.mxu1 %v1869_v4 }
  0x40   : > { %1618 = vmatpush3.msk.msra.mxu0 %vm688_vm14, %v1871_v37  ;;  %1653 = vmatpush3.msk.msra.mxu1 %vm813_vm15, %v1871_v37  ;;  %vm681_vm14 = vcmp.eq.s32.totalorder %v663_v46, %v2036_v25  ;;  %vm680_vm15 = vcmp.eq.s32.totalorder %v662_v47, %v2036_v25 }
  0x41   : > { %1619 = vmatprep.subr.mxu0 %v1869_v4  ;;  %1654 = vmatprep.subr.mxu1 %v1869_v4 }
  0x42   : > { %1620 = vmatpush3.msk.msra.mxu0 %vm687_vm0, %v1871_v37  ;;  %1655 = vmatpush3.msk.msra.mxu1 %vm812_vm3, %v1871_v37  ;;  %vm679_vm0 = vcmp.eq.s32.totalorder %v661_v48, %v2036_v25  ;;  %vm678_vm3 = vcmp.eq.s32.totalorder %v2034_v24, %v2036_v25 }
  0x43   : > { %1621 = vmatprep.subr.mxu0 %v1869_v4  ;;  %1656 = vmatprep.subr.mxu1 %v1869_v4 }
  0x44   : > { %1622 = vmatpush3.msk.msra.mxu0 %vm686_vm4, %v1871_v37  ;;  %1657 = vmatpush3.msk.msra.mxu1 %vm811_vm5, %v1871_v37  ;;  %vm943_vm4 = vcmp.eq.s32.totalorder %v2043_v30, %v927_v57  ;;  %vm1063_vm5 = vcmp.eq.s32.totalorder %v2043_v30, %v1047_v58 }
  0x45   : > { %1623 = vmatprep.subr.mxu0 %v1869_v4  ;;  %1658 = vmatprep.subr.mxu1 %v1869_v4 }
  0x46   : > { %1624 = vmatpush3.msk.msra.mxu0 %vm685_vm6, %v1871_v37  ;;  %1659 = vmatpush3.msk.msra.mxu1 %vm810_vm7, %v1871_v37  ;;  %vm942_vm6 = vcmp.eq.s32.totalorder %v2054_v33, %v927_v57  ;;  %vm1062_vm7 = vcmp.eq.s32.totalorder %v2054_v33, %v1047_v58 }
  0x47   : > { %1625 = vmatprep.subr.mxu0 %v1869_v4  ;;  %1660 = vmatprep.subr.mxu1 %v1869_v4 }
  0x48   : > { %1639 = vmatprep.mubr.msk.f32.mxu0 %vm1870_vm1, %v1869_v4  ;;  %1674 = vmatprep.mubr.msk.f32.mxu1 %vm1870_vm1, %v1869_v4 }
  0x49   : > { %1626 = vmatpush3.msk.msra.mxu0 %vm684_vm8, %v1871_v37  ;;  %1661 = vmatpush3.msk.msra.mxu1 %vm809_vm9, %v1871_v37  ;;  %vm941_vm8 = vcmp.eq.s32.totalorder %v2067_v35, %v927_v57  ;;  %vm1061_vm9 = vcmp.eq.s32.totalorder %v2067_v35, %v1047_v58 }
  0x4a   : > { %1627 = vmatprep.subr.mxu0 %v1869_v4  ;;  %1662 = vmatprep.subr.mxu1 %v1869_v4 }
  0x4b   : > { %1628 = vmatpush3.msk.msra.mxu0 %vm683_vm10, %v1871_v37  ;;  %1663 = vmatpush3.msk.msra.mxu1 %vm808_vm11, %v1871_v37  ;;  %vm940_vm10 = vcmp.eq.s32.totalorder %v2079_v36, %v927_v57  ;;  %vm1060_vm11 = vcmp.eq.s32.totalorder %v2079_v36, %v1047_v58 }
  0x4c   : > { %1629 = vmatprep.subr.mxu0 %v1869_v4  ;;  %1664 = vmatprep.subr.mxu1 %v1869_v4 }
  0x4d   : > { %1630 = vmatpush3.msk.msra.mxu0 %vm682_vm12, %v1871_v37  ;;  %1665 = vmatpush3.msk.msra.mxu1 %vm807_vm13, %v1871_v37  ;;  %vm939_vm12 = vcmp.eq.s32.totalorder %v2090_v38, %v927_v57  ;;  %vm938_vm13 = vcmp.eq.s32.totalorder %v2101_v39, %v927_v57 }
  0x4e   : > { %1631 = vmatprep.subr.mxu0 %v1869_v4  ;;  %1666 = vmatprep.subr.mxu1 %v1869_v4 }
  0x4f   : > { %1632 = vmatpush3.msk.msra.mxu0 %vm681_vm14, %v1871_v37  ;;  %1667 = vmatpush3.msra.mxu1 %v1869_v4  ;;  %vm937_vm14 = vcmp.eq.s32.totalorder %v2112_v40, %v927_v57 }
  0x50   : > { %1633 = vmatprep.subr.mxu0 %v1869_v4  ;;  %1668 = vmatprep.subr.mxu1 %v1869_v4 }
  0x51   : > { %1634 = vmatpush3.msk.msra.mxu0 %vm680_vm15, %v1871_v37  ;;  %1669 = vmatpush3.msra.mxu1 %v1869_v4  ;;  %vm936_vm15 = vcmp.eq.s32.totalorder %v2123_v41, %v927_v57 }
  0x52   : > { %1635 = vmatprep.subr.mxu0 %v1869_v4  ;;  %1670 = vmatprep.subr.mxu1 %v1869_v4 }
  0x53   : > { %1636 = vmatpush3.msk.msra.mxu0 %vm679_vm0, %v1871_v37  ;;  %1671 = vmatpush3.msra.mxu1 %v1869_v4 }
  0x54   : > { %1637 = vmatprep.subr.mxu0 %v1869_v4  ;;  %1672 = vmatprep.subr.mxu1 %v1869_v4 }
  0x55   : > { %1638 = vmatpush3.msk.msra.mxu0 %vm678_vm3, %v1871_v37  ;;  %1673 = vmatpush3.msra.mxu1 %v1869_v4 }
  0x56   : > { %1677 = vmatprep.subr.mxu0 %v1869_v4  ;;  %1712 = vmatprep.subr.mxu1 %v1869_v4 }
  0xec   : > { %v563_v49 = vpop.f32.mrf.mxu1 }
  0xee   : > { %v1595_v50 = vpop.f32.mrf.mxu1 }
  0xf3   : > { %v478_v52 = vpop.f32.mrf.mxu0 }
  0xf4   : > { %v483_v53 = vmul.f32 %v482_v51, %v478_v52 }
  0xf5   : > { %v1584_v54 = vpop.f32.mrf.mxu0  ;;  %v646_v55 = vpop.f32.mrf.mxu1 }
  0xf6   : > { %v567_v56 = vadd.f32 %v563_v49, %v483_v53 }
  0xf7   : > { %v1606_v60 = vpop.f32.mrf.mxu1 }
  0xf8   : > { %v650_v61 = vadd.f32 %v646_v55, %v567_v56 }
  0xfa   : > { %v2214_v62 = vadd.f32 %v1351_v59, %v650_v61 }
  0xfc   : > { %1640 = vmatmul.mubr.f32.vlgmr.msra.gmra.mxu0 %v2214_v62  ;;  %1675 = vmatmul.mubr.f32.vlgmr.msra.gmra.mxu1 %v2214_v62 }
  0xfd   : > { %1678 = vmatpush3.msk.msra.mxu0 %vm943_vm4, %v1871_v37  ;;  %1713 = vmatpush3.msk.msra.mxu1 %vm1063_vm5, %v1871_v37 }
  0xfe   : > { %1679 = vmatprep.subr.mxu0 %v1869_v4  ;;  %1714 = vmatprep.subr.mxu1 %v1869_v4 }
  0xff   : > { %1680 = vmatpush3.msk.msra.mxu0 %vm942_vm6, %v1871_v37  ;;  %1715 = vmatpush3.msk.msra.mxu1 %vm1062_vm7, %v1871_v37 }
 0x100   : > { %1681 = vmatprep.subr.mxu0 %v1869_v4  ;;  %1716 = vmatprep.subr.mxu1 %v1869_v4 }
 0x101   : > { %1682 = vmatpush3.msk.msra.mxu0 %vm941_vm8, %v1871_v37  ;;  %1717 = vmatpush3.msk.msra.mxu1 %vm1061_vm9, %v1871_v37 }
 0x102   : > { %1683 = vmatprep.subr.mxu0 %v1869_v4  ;;  %1718 = vmatprep.subr.mxu1 %v1869_v4 }
 0x103   : > { %1684 = vmatpush3.msk.msra.mxu0 %vm940_vm10, %v1871_v37  ;;  %1719 = vmatpush3.msk.msra.mxu1 %vm1060_vm11, %v1871_v37 }
 0x104   : > { %1685 = vmatprep.subr.mxu0 %v1869_v4  ;;  %1720 = vmatprep.subr.mxu1 %v1869_v4 }
 0x105   : > { %1686 = vmatpush3.msk.msra.mxu0 %vm939_vm12, %v1871_v37  ;;  %1721 = vmatpush3.msra.mxu1 %v1869_v4 }
 0x106   : > { %1687 = vmatprep.subr.mxu0 %v1869_v4  ;;  %1722 = vmatprep.subr.mxu1 %v1869_v4 }
 0x107   : > { %1688 = vmatpush3.msk.msra.mxu0 %vm938_vm13, %v1871_v37  ;;  %1723 = vmatpush3.msra.mxu1 %v1869_v4 }
 0x108   : > { %1689 = vmatprep.subr.mxu0 %v1869_v4  ;;  %1724 = vmatprep.subr.mxu1 %v1869_v4 }
 0x109   : > { %1690 = vmatpush3.msk.msra.mxu0 %vm937_vm14, %v1871_v37  ;;  %1725 = vmatpush3.msra.mxu1 %v1869_v4 }
 0x10a   : > { %1691 = vmatprep.subr.mxu0 %v1869_v4  ;;  %1726 = vmatprep.subr.mxu1 %v1869_v4 }
 0x10b   : > { %1692 = vmatpush3.msk.msra.mxu0 %vm936_vm15, %v1871_v37  ;;  %1727 = vmatpush3.msra.mxu1 %v1869_v4 }
 0x10c   : > { %1693 = vmatprep.subr.mxu0 %v1869_v4  ;;  %1728 = vmatprep.subr.mxu1 %v1869_v4 }
 0x10d   : > { %1694 = vmatpush3.msra.mxu0 %v1869_v4  ;;  %1729 = vmatpush3.msra.mxu1 %v1869_v4 }
 0x10e   : > { %1695 = vmatprep.subr.mxu0 %v1869_v4  ;;  %1730 = vmatprep.subr.mxu1 %v1869_v4 }
 0x10f   : > { %1696 = vmatpush3.msra.mxu0 %v1869_v4  ;;  %1731 = vmatpush3.msra.mxu1 %v1869_v4 }
 0x110   : > { %1697 = vmatprep.subr.mxu0 %v1869_v4  ;;  %1732 = vmatprep.subr.mxu1 %v1869_v4 }
 0x111   : > { %1698 = vmatpush3.msra.mxu0 %v1869_v4  ;;  %1733 = vmatpush3.msra.mxu1 %v1869_v4 }
 0x112   : > { %1699 = vmatprep.subr.mxu0 %v1869_v4  ;;  %1734 = vmatprep.subr.mxu1 %v1869_v4 }
 0x113   : > { %1700 = vmatpush3.msra.mxu0 %v1869_v4  ;;  %1735 = vmatpush3.msra.mxu1 %v1869_v4 }
 0x114   : > { %1701 = vmatprep.subr.mxu0 %v1869_v4  ;;  %1736 = vmatprep.subr.mxu1 %v1869_v4 }
 0x115   : > { %1702 = vmatpush3.msra.mxu0 %v1869_v4  ;;  %1737 = vmatpush3.msra.mxu1 %v1869_v4 }
 0x116   : > { %1703 = vmatprep.subr.mxu0 %v1869_v4  ;;  %1738 = vmatprep.subr.mxu1 %v1869_v4 }
 0x117   : > { %1704 = vmatpush3.msra.mxu0 %v1869_v4  ;;  %1739 = vmatpush3.msra.mxu1 %v1869_v4 }
 0x118   : > { %1705 = vmatprep.subr.mxu0 %v1869_v4  ;;  %1740 = vmatprep.subr.mxu1 %v1869_v4 }
 0x119   : > { %1706 = vmatpush3.msra.mxu0 %v1869_v4  ;;  %1741 = vmatpush3.msra.mxu1 %v1869_v4 }
 0x11a   : > { %1707 = vmatprep.subr.mxu0 %v1869_v4  ;;  %1742 = vmatprep.subr.mxu1 %v1869_v4 }
 0x11b   : > { %1708 = vmatpush3.msra.mxu0 %v1869_v4  ;;  %1709 = vmatprep.mubr.msk.f32.mxu0 %vm1870_vm1, %v1869_v4 }
 0x11c   : > { %1743 = vmatpush3.msra.mxu1 %v1869_v4  ;;  %1744 = vmatprep.mubr.msk.f32.mxu1 %vm1870_vm1, %v1869_v4 }
 0x11d   : > { %1710 = vmatmul.mubr.f32.vlgmr.msra.gmra.mxu0 %v2214_v62  ;;  %1745 = vmatmul.mubr.f32.vlgmr.msra.gmra.mxu1 %v2214_v62 }
 0x1bc   : > { %v792_v63 = vpop.f32.mrf.mxu0  ;;  %v917_v0 = vpop.f32.mrf.mxu1 }
 0x1bd   : > { %v1409_v3 = vmul.f32 -1.442695, %v917_v0  ;;  %v1384_v5 = vmul.f32 -1.442695, %v792_v63 }
 0x1be   : > { %v1641_v1 = vpop.f32.mrf.mxu0  ;;  %v1676_v2 = vpop.f32.mrf.mxu1 }
 0x1bf   : > { %1790 = vpow2.f32 %v1409_v3 }
 0x1c0   : > { %1792 = vpow2.f32 %v1384_v5 }
 0x1cc   : > { %v1791_v6 = vpop.eup %1790 }
 0x1cd   : > { %v1793_v7 = vpop.eup %1792  ;;  %v924_v8 = vadd.f32 1.0, %v1791_v6 }
 0x1ce   : > { %v799_v9 = vadd.f32 1.0, %v1793_v7 }
 0x1cf   : > { %1794 = vrcp.f32 %v924_v8 }
 0x1d0   : > { %1796 = vrcp.f32 %v799_v9 }
 0x1dc   : > { %v1795_v14 = vpop.eup %1794 }
 0x1dd   : > { %v1042_v4 = vpop.f32.mrf.mxu0  ;;  %v1162_v10 = vpop.f32.mrf.mxu1  ;;  %v1173_v18 = vmul.f32 %v1795_v14, %v1172_v15 }
 0x1de   : > { %1798 = vtanh.f32 %v1042_v4  ;;  %v1434_v11 = vmul.f32 -1.442695, %v1162_v10  ;;  %v1797_v16 = vpop.eup %1796 }
 0x1df   : > { %v1711_v12 = vpop.f32.mrf.mxu0  ;;  %v1746_v13 = vpop.f32.mrf.mxu1 }
 0x1e0   : > { %1800 = vpow2.f32 %v1434_v11 }
 0x1eb   : > { %v1799_v17 = vpop.eup %1798 }
 0x1ec   : > { %v1174_v19 = vmul.f32 %v1799_v17, %v1797_v16 }
 0x1ed   : > { %v1801_v20 = vpop.eup %1800 }
 0x1ee   : > { %v1175_v21 = vadd.f32 %v1174_v19, %v1173_v18  ;;  %v1169_v22 = vadd.f32 1.0, %v1801_v20 }
 0x1f0   : > { %1802 = vtanh.f32 %v1175_v21  ;;  %1179 = vst.msk [vmem:[%s357_s24] sm:$0xff] %vm493_vm2, %v1175_v21 }
 0x1f1   : > { %1804 = vrcp.f32 %v1169_v22 }
 0x1fd   : > { %v1803_v23 = vpop.eup %1802  ;;  %1184 = sbr.rel (%p1435_p13) target bundleno = 515 (0x203), region = 56 }
 0x1fe   : > { %v1805_v24 = vpop.eup %1804 }
 0x1ff   : > { %v1177_v25 = vmul.f32 %v1805_v24, %v1803_v23 }
 0x201   : > { %1178 = vst.msk [vmem:[%s382_s23] sm:$0xff] %vm493_vm2, %v1177_v25 }
 0x202   : > { %1185 = vst.msk [vmem:[#allocation2] sm:$0xff] %vm493_vm2, %v1177_v25 }
 0x203 PF: > { %s1437_s10 = sshll.u32 %s1939_s9, 7  ;;  %s2380_s26 = sld [smem:[#allocation12_spill]] }
 0x204   : > { %s1207_s13 = sshll.u32 %s357_s24, 4  ;;  %s2381_s20 = sand.u32 1, %s1858_s28   ;;  %s1208_s13 = int_to_ptr.vmem [resolvable:$true] %s1207_s13 }
 0x205   : > { %s1191_s23 = scalar_lea.sflag [#allocation4], %s2381_s20  ;;  %s1806_s22 = scalar_lea.vmem %s1208_s13, 128 }
 0x206   : > { %p1807_p0 = scmp.ne.s32.totalorder %s1208_s13, %s1806_s22  ;;  %s1872_s25 = smov [#allocation3]  }
 0x207   : > { %s1810_s29 = sshll.u32 %s1872_s25, 4  ;;  %s1811_s29 = int_to_ptr.vmem [resolvable:$false] %s1810_s29 }
 0x208   : > { %p1808_p1 = pnand %p1807_p0, %p1956_p5  ;;  %s1812_s14 = scalar_lea.vmem %s1811_s29, 256 }
 0x209   : > { %s1205_s12 = scalar_lea.hbm %s2380_s26, %s1437_s10  ;;  %p1813_p3 = scmp.lt.s32.totalorder %s1208_s13, %s1811_s29 }
 0x20a   : > { %p1809_p2 = pneg %p1808_p1  ;;  %p1814_p4 = scmp.lt.s32.totalorder %s1812_s14, %s1806_s22 }
 0x20c   : > { %p1815_p7 = por %p1814_p4, %p1813_p3 }
 0x20e   : > { %p1816_p8 = pnand %p1815_p7, %p1809_p2 }
 0x210   : > { %1819 = shalt.err (!%p1816_p8)
}
 0x211   : > { %s1820_s9 = scalar_lea.hbm %s1205_s12, 128  ;;  %s1824_s27 = scalar_lea.hbm %s2380_s26, 256 }
 0x212   : > { %p1821_p9 = scmp.ne.s32.totalorder %s1205_s12, %s1820_s9  ;;  %p1825_p12 = scmp.lt.s32.totalorder %s1205_s12, %s2380_s26 }
 0x213   : > { %p1826_p13 = scmp.lt.s32.totalorder %s1824_s27, %s1820_s9 }
 0x214   : > { %p1822_p10 = pnand %p1821_p9, %p1956_p5 }
 0x215   : > { %p1827_p0 = por %p1826_p13, %p1825_p12 }
 0x216   : > { %p1823_p11 = pneg %p1822_p10 }
 0x218   : > { %p1828_p1 = pnand %p1827_p0, %p1823_p11 }
 0x21a   : > { %1831 = shalt.err (!%p1828_p1)
}
 0x21b   : > { %1747 = dma.vmem_to_hbm [thread:$0]  (%p1956_p5), %s1208_s13, 128, %s1205_s12, %s1191_s23  }
 0x21c PF: > { %s2382_s8 = sld [smem:[#allocation8_spill]] }
 0x21d   : > { %s2383_s16 = sld [smem:[#allocation6_spill]] }
 0x222   : > { %p1753_p2 = scmp.ge.s32.totalorder %s2382_s8, 2 }
 0x223   : > { %s1226_s10 = sand.u32 1, %s2383_s16  }
 0x224   : > { %p1750_p3 = pnand %p1753_p2, %p1960_p6  ;;  %s1227_s21 = scalar_lea.sflag [#allocation4], %s1226_s10 }
 0x226   : > { %p1751_p4 = pneg %p1750_p3 }
 0x228   : > { %1849 = dma.done.wait (%p1751_p4), %s1227_s21, 128  }
 0x229   : > { %1851 = vsyncadd (%p1751_p4), %s1227_s21, 4294967168  ;;  %s2385_s30 = sld [smem:[#allocation9_spill]]  ;;  %s2388_s27 = smov %s1858_s28 }
 0x22a   : > { %s2386_s11 = sld [smem:[#allocation7_spill]] }
 0x22b   : > { %s2387_s29 = sld [smem:[#allocation10_spill]] }
 0x22f   : > { %p19_p7 = scmp.ge.s32.totalorder %s2385_s30, 4  }
 0x230   : > { %s2389_s28 = smov %s2386_s11 }
 0x231   :  { %21 = sbr.rel (!%p19_p7) target bundleno = 5 (0x5), region = 115 }
 0x236   :  { %1232 = vsyncpa [#allocation4], 1 }
 0x237   :  { %1234 = vsyncpa [#allocation4 + $0x1], 1 }

</bundles_post_ra>
